<compile_context>
chip_gen: v7x
topology: tpu7x:2x2x1
jax: 0.10.0
libtpu: 0.0.40
codegen_flags: <defaults>
</compile_context>

<pallas_src>
import jax
import jax.numpy as jnp
from jax.experimental import pallas as pl
from jax.experimental.pallas import tpu as pltpu


def _add_pos_emb_kernel(x_ref, pos_ref, o_ref):
    # Mixed-dtype safe: jnp promotes (bf16 + f32 -> f32), adds on the VPU, then a
    # single cast back to the output dtype.  Pure streaming elementwise work.
    o_ref[...] = (x_ref[...] + pos_ref[...]).astype(o_ref.dtype)


def _round_up(n, m):
    return ((n + m - 1) // m) * m


def add_positional_embedding(x, pos_emb, *, target_block_bytes=4 * 1024 * 1024):
    """x: [B, S, D]; pos_emb: [1, max_len, D] -> x + pos_emb[:, :S, :] (dtype of x)."""
    B, S, D = x.shape
    one, max_len, Dp = pos_emb.shape
    assert one == 1 and Dp == D, "embedding_dim mismatch between input and positional table"
    assert S <= max_len, "seq_len exceeds max_len of the positional table"

    # Flatten (S, D) -> N so the tiled axis is always lane-dense, independent of D.
    N = S * D
    x_flat = x.reshape(B, N)
    pos_flat = pos_emb.reshape(1, max_len * D)  # first S*D elements == pos[:, :S, :]

    x_item = jnp.dtype(x.dtype).itemsize
    pos_item = jnp.dtype(pos_emb.dtype).itemsize

    # Size the tile so the (B, tile_n) x-block hits ~target_block_bytes.
    tile_n = max(128, (target_block_bytes // max(1, B * x_item)) // 128 * 128)
    tile_n = min(tile_n, _round_up(N, 128))
    num_tiles = pl.cdiv(N, tile_n)  # tail tile handled by Pallas boundary masking

    # Explicit VMEM budget: 2 pipeline buffers x (x + out + pos) blocks + headroom.
    x_block_bytes = B * tile_n * x_item
    pos_block_bytes = tile_n * pos_item
    live_bytes = 2 * (2 * x_block_bytes + pos_block_bytes)
    vmem_limit = min(max(int(live_bytes * 1.5) + (1 << 20), 16 * 1024 * 1024),
                     48 * 1024 * 1024)

    grid_spec = pltpu.PrefetchScalarGridSpec(
        num_scalar_prefetch=0,
        grid=(num_tiles,),
        in_specs=[
            pl.BlockSpec((B, tile_n), lambda n: (0, n)),  # x, whole batch in the block
            pl.BlockSpec((1, tile_n), lambda n: (0, n)),  # pos, broadcast over batch
        ],
        out_specs=pl.BlockSpec((B, tile_n), lambda n: (0, n)),
    )

    out_flat = pl.pallas_call(
        _add_pos_emb_kernel,
        out_shape=jax.ShapeDtypeStruct((B, N), x.dtype),
        grid_spec=grid_spec,
        compiler_params=pltpu.CompilerParams(
            dimension_semantics=("parallel",),  # shardable across both TCs on v7x
            vmem_limit_bytes=vmem_limit,
        ),
    )(x_flat, pos_flat)

    return out_flat.reshape(B, S, D)


if __name__ == "__main__":
    key = jax.random.PRNGKey(0)
    kx, kp, kx2, kp2, kx3, kp3 = jax.random.split(key, 6)

    # --- Test 1: module-sized f32 case (batch=2, seq=8, dim=32, max_len=16) ---
    B, S, D, max_len = 2, 8, 32, 16
    pos_emb = jax.random.normal(kp, (1, max_len, D), dtype=jnp.float32)
    x = jax.random.normal(kx, (B, S, D), dtype=jnp.float32)

    out = jax.block_until_ready(add_positional_embedding(x, pos_emb))
    ref = x + pos_emb[:, :S, :]
    assert out.shape == (B, S, D)
    assert jnp.allclose(out, ref, atol=1e-6), "f32 mismatch vs reference"

    # --- Test 2: bf16, small tile -> multi-tile grid with a masked tail tile ---
    B2, S2, D2, max_len2 = 2, 24, 32, 32
    pos2 = jax.random.normal(kp2, (1, max_len2, D2), dtype=jnp.float32).astype(jnp.bfloat16)
    x2 = jax.random.normal(kx2, (B2, S2, D2), dtype=jnp.float32).astype(jnp.bfloat16)

    out2 = jax.block_until_ready(
        add_positional_embedding(x2, pos2, target_block_bytes=2048))  # tile_n=512, N=768
    ref2 = x2 + pos2[:, :S2, :]
    assert out2.shape == (B2, S2, D2)
    assert jnp.allclose(out2.astype(jnp.float32), ref2.astype(jnp.float32), atol=1e-6), \
        "bf16 mismatch vs reference"

    # --- Test 3: mixed dtypes (bf16 activations + f32 table), in-kernel promotion ---
    B3, S3, D3, max_len3 = 2, 8, 128, 16
    pos3 = jax.random.normal(kp3, (1, max_len3, D3), dtype=jnp.float32)
    x3 = jax.random.normal(kx3, (B3, S3, D3), dtype=jnp.float32).astype(jnp.bfloat16)

    out3 = jax.block_until_ready(add_positional_embedding(x3, pos3))
    ref3 = (x3.astype(jnp.float32) + pos3[:, :S3, :]).astype(jnp.bfloat16)
    assert out3.dtype == jnp.bfloat16 and out3.shape == (B3, S3, D3)
    assert jnp.allclose(out3.astype(jnp.float32), ref3.astype(jnp.float32), atol=1e-2), \
        "mixed-dtype mismatch vs reference"

    print("KERNEL_OK")
</pallas_src>

<mosaic_0001>
module attributes {stable_mosaic.version = 11 : i64} {
  func.func @_add_pos_emb_kernel(%arg0: i32, %arg1: memref<2x256xf32, #tpu.memory_space<vmem>>, %arg2: memref<1x256xf32, #tpu.memory_space<vmem>>, %arg3: memref<2x256xf32, #tpu.memory_space<vmem>>) attributes {dimension_semantics = [#tpu.dimension_semantics<parallel>], iteration_bounds = array<i64: 1>, scalar_prefetch = 0 : i64, scratch_operands = 0 : i64, tpu.core_type = #tpu.core_type<tc>, window_params = [{transform_indices = @transform_0, window_bounds = array<i64: 2, 256>}, {transform_indices = @transform_1, window_bounds = array<i64: 1, 256>}, {transform_indices = @transform_2, window_bounds = array<i64: 2, 256>}]} {
    %c0 = arith.constant 0 : index
    %c0_0 = arith.constant 0 : index
    %0 = vector.load %arg1[%c0, %c0_0] : memref<2x256xf32, #tpu.memory_space<vmem>>, vector<2x256xf32>
    %c0_1 = arith.constant 0 : index
    %c0_2 = arith.constant 0 : index
    %1 = vector.load %arg2[%c0_1, %c0_2] : memref<1x256xf32, #tpu.memory_space<vmem>>, vector<1x256xf32>
    %2 = vector.broadcast %1 : vector<1x256xf32> to vector<2x256xf32>
    %3 = arith.addf %0, %2 : vector<2x256xf32>
    %c0_3 = arith.constant 0 : index
    %c0_4 = arith.constant 0 : index
    %4 = vector.load %arg3[%c0_3, %c0_4] : memref<2x256xf32, #tpu.memory_space<vmem>>, vector<2x256xf32>
    tpu.vector_store %arg3[%c0_3, %c0_4], %3 {strides = array<i32>} : memref<2x256xf32, #tpu.memory_space<vmem>>, vector<2x256xf32>,
    return
  }
  func.func @transform_0(%arg0: i32) -> (i32, i32) {
    %c0_i32 = arith.constant 0 : i32
    %c0_i32_0 = arith.constant 0 : i32
    return %c0_i32, %arg0 : i32, i32
  }
  func.func @transform_1(%arg0: i32) -> (i32, i32) {
    %c0_i32 = arith.constant 0 : i32
    %c0_i32_0 = arith.constant 0 : i32
    return %c0_i32, %arg0 : i32, i32
  }
  func.func @transform_2(%arg0: i32) -> (i32, i32) {
    %c0_i32 = arith.constant 0 : i32
    %c0_i32_0 = arith.constant 0 : i32
    return %c0_i32, %arg0 : i32, i32
  }
}

</mosaic_0001>

<bundles_post_ra>
// kernel: tpu_custom_call.1
= control target key start
LH: loop header
LB: loop body
LE: loop exit
PB: predicated region body
PF: predicated region fallthrough
CT: control target
= control target key end

     0   :  { %7 = vsyncpa [#allocation3], 0  ;;  %s215_s0 = inlined_call_operand.hbm [shape: f32[2,256], index: 0, kind: input, shape index: {}]   ;;  %s216_s1 = inlined_call_operand.hbm [shape: f32[1,512], index: 1, kind: input, shape index: {}]   ;;  %s217_s2 = inlined_call_operand.hbm [shape: f32[2,256], index: 2, kind: output, shape index: {}]  }
   0x1   :  { %8 = vsyncpa [#allocation6], 0 }
   0x2   :  { %9 = vsyncpa [#allocation4], 0  ;;  %s150_s9 = smov [#allocation2]   ;;  %s151_s11 = smov [#allocation5]  }
   0x3   :  { %s16_s10 = sshll.u32 %s150_s9, 4  ;;  %s26_s12 = sshll.u32 %s151_s11, 4  ;;  %s17_s10 = int_to_ptr.vmem [resolvable:$true] %s16_s10  ;;  %s169_s12 = int_to_ptr.vmem [resolvable:$true] %s26_s12 }
   0x4   :  { %s78_s15 = scalar_lea.hbm %s215_s0, 64 }
   0x5   :  { %p79_p0 = scmp.ne.s32.totalorder %s215_s0, %s78_s15  ;;  %p82_p1 = scmp.lt.u32.totalorder %s78_s15, %s215_s0 }
   0x7   :  { %p84_p2 = pnand %p82_p1, %p79_p0 }
   0x9   :  { %87 = shalt.err (!%p84_p2)
}
   0xa   :  { %s88_s20 = scalar_lea.vmem %s17_s10, 64  ;;  %p93_p4 = scmp.lt.s32.totalorder %s17_s10, %s17_s10 }
   0xb   :  { %p89_p3 = scmp.ne.s32.totalorder %s17_s10, %s88_s20  ;;  %p94_p5 = scmp.lt.s32.totalorder %s88_s20, %s88_s20 }
   0xd   :  { %p95_p6 = por %p94_p5, %p93_p4 }
   0xf   :  { %p96_p7 = pnand %p95_p6, %p89_p3 }
  0x11   :  { %99 = shalt.err (!%p96_p7)
}
  0x12   :  { %19 = dma.hbm_to_vmem [thread:$0]  %s215_s0, 64, %s17_s10, [#allocation3]  }
  0x13   :  { %s100_s25 = scalar_lea.hbm %s216_s1, 32  ;;  %s102_s30 = scalar_lea.hbm %s216_s1, 64 }
  0x14   :  { %p101_p8 = scmp.ne.s32.totalorder %s216_s1, %s100_s25  ;;  %p103_p9 = scmp.lt.u32.totalorder %s102_s30, %s100_s25 }
  0x15   :  { %p104_p10 = scmp.lt.u32.totalorder %s100_s25, %s216_s1 }
  0x17   :  { %p105_p11 = por %p104_p10, %p103_p9 }
  0x19   :  { %p106_p12 = pnand %p105_p11, %p101_p8 }
  0x1b   :  { %109 = shalt.err (!%p106_p12)
}
  0x1c   :  { %s110_s0 = scalar_lea.vmem %s169_s12, 32  ;;  %p115_p0 = scmp.lt.s32.totalorder %s169_s12, %s169_s12 }
  0x1d   :  { %p111_p13 = scmp.ne.s32.totalorder %s169_s12, %s110_s0  ;;  %p116_p1 = scmp.lt.s32.totalorder %s110_s0, %s110_s0 }
  0x1f   :  { %p117_p2 = por %p116_p1, %p115_p0 }
  0x21   :  { %p118_p3 = pnand %p117_p2, %p111_p13 }
  0x23   :  { %121 = shalt.err (!%p118_p3)
}
  0x24   :  { %29 = dma.hbm_to_vmem [thread:$0]  %s216_s1, 32, %s169_s12, [#allocation6]  }
  0x25   :  { %144 = dma.done.wait [#allocation3], 64  }
  0x26   :  { %145 = vsyncadd [#allocation3], 4294967232 }
  0x27   :  { %146 = dma.done.wait [#allocation6], 32  }
  0x28   :  { %147 = vsyncadd [#allocation6], 4294967264  ;;  %v39_v0 = vlaneseq  ;;  %v152_v1 = vmov 1983009808   ;;  %v37_v7 = vld [vmem:[#allocation5] sm:$0x3] }
  0x29   :  { %v49_v2 = vunpack.c.l.s4 %v152_v1  ;;  %v36_v12 = vld [vmem:[#allocation2] sm:$0xf]  ;;  %s153_s7 = smov [#allocation7]  }
  0x2a   :  { %v40_v3 = vshrl.u32 %v39_v0, 7  ;;  %s64_s8 = sshll.u32 %s153_s7, 4  ;;  %s65_s8 = int_to_ptr.vmem [resolvable:$true] %s64_s8 }
  0x2b   :  { %v50_v6 = vunpack.c.0.s8 %v49_v2  ;;  %s122_s1 = scalar_lea.vmem %s65_s8, 64  ;;  %p127_p5 = scmp.lt.s32.totalorder %s65_s8, %s65_s8 }
  0x2c   :  { %v41_v4 = vsub.s32 0, %v40_v3  ;;  %v45_v5 = vsub.s32 1, %v40_v3  ;;  %p123_p4 = scmp.ne.s32.totalorder %s65_s8, %s122_s1  ;;  %p128_p6 = scmp.lt.s32.totalorder %s122_s1, %s122_s1 }
  0x2d   :  { %v53_v10 = vsub.s32 %v50_v6, %v40_v3 }
  0x2e   :  { %v42_v8 = vrot.slane %v37_v7, %v41_v4  ;;  %v46_v9 = vrot.slane %v37_v7, %v45_v5  ;;  %p129_p7 = por %p128_p6, %p127_p5 }
  0x30   :  { %v47_v11 = vcombine.low %v42_v8, %v46_v9  ;;  %p130_p8 = pnand %p129_p7, %p123_p4 }
  0x32   :  { %v54_v13 = vrot.slane %v47_v11, %v53_v10 }
  0x34   :  { %v56_v14 = vadd.f32 %v54_v13, %v36_v12 }
  0x36   :  { %57 = vst [vmem:[#allocation7] sm:$0xf] %v56_v14 }
  0x37   :  { %133 = shalt.err (!%p130_p8)
}
  0x38   :  { %s134_s11 = scalar_lea.hbm %s217_s2, 64 }
  0x39   :  { %p135_p9 = scmp.ne.s32.totalorder %s217_s2, %s134_s11  ;;  %p138_p10 = scmp.lt.u32.totalorder %s134_s11, %s217_s2 }
  0x3b   :  { %p140_p11 = pnand %p138_p10, %p135_p9 }
  0x3d   :  { %143 = shalt.err (!%p140_p11)
}
  0x3e   :  { %67 = dma.vmem_to_hbm [thread:$0]  %s65_s8, 64, %s217_s2, [#allocation4]  }
  0x3f   :  { %148 = dma.done.wait [#allocation4], 64  }
  0x40   :  { %149 = vsyncadd [#allocation4], 4294967232 }
  0x41   :  { %71 = vsyncpa [#allocation3], 1 }
  0x42   :  { %72 = vsyncpa [#allocation6], 1 }
  0x43   :  { %73 = vsyncpa [#allocation4], 1 }

</bundles_post_ra>
